<compile_context>
chip_gen: v6e
topology: v6e:2x2x1
jax: 0.10.0
libtpu: 0.0.40
codegen_flags: <defaults>
</compile_context>

<pallas_src>
import jax
import jax.numpy as jnp
from jax.experimental import pallas as pl
from jax.experimental.pallas import tpu as pltpu

B = 2            # batch
D_IN = 784       # 1*28*28 after flatten
K_PAD = 896      # 7 * 128, zero-padded K for aligned MXU tiles
D_H = 256
D_OUT = 10
R_PAD = 8        # sublane-aligned row count per complex component
MROWS = 2 * R_PAD  # stacked [xr; xi] rows (re = rows 0..7, im = rows 8..15)


def _softmax_lastdim(v):
    m = jnp.max(v, axis=-1, keepdims=True)
    e = jnp.exp(v - m)
    return e / jnp.sum(e, axis=-1, keepdims=True)   # exact normalization


def complexnet_kernel(x_ref, w1_ref, s1_ref, b1_ref, w2_ref, b2_ref, o_ref):
    # x_ref : [16, 896]  bf16; rows 0..7 = xr (rows >= B zero), rows 8..15 = xi
    # w1_ref: [896, 512] int8 = quantized [W1r | W1i]   (rows >= D_IN are zero)
    # s1_ref: [1, 512]   f32  per-output-column dequant scales
    # b1_ref: [1, 512]   f32  = [b1r | b1i]
    # w2_ref: [512, 20]  bf16 = [[W2r, W2i], [-W2i, W2r]]
    # b2_ref: [1, 20]    f32  = [b2r - b2i | b2r + b2i]
    # o_ref : [8, 20]    f32  = [softmax(re) | softmax(im)]
    x = x_ref[...]                                        # already bf16

    # ----- fc1 = ComplexLinear(784, 256): one stacked matmul instead of four -----
    # int8 -> f32 -> bf16 dequant (scale applied in the f32 epilogue below).
    w1 = w1_ref[...].astype(jnp.float32).astype(jnp.bfloat16)
    h1 = (jnp.dot(x, w1, preferred_element_type=jnp.float32) * s1_ref[...]
          + b1_ref[...])                                  # [16, 512] f32

    re_rows = h1[0:R_PAD]          # xr @ [W1r | W1i] + [b1r | b1i]  (8-row tile)
    im_rows = h1[R_PAD:MROWS]      # xi @ [W1r | W1i] + [b1r | b1i]  (8-row tile)
    h_re = re_rows[:, :D_H] - im_rows[:, D_H:]   # fr(xr) - fi(xi)  (bias: b1r - b1i)
    h_im = im_rows[:, :D_H] + re_rows[:, D_H:]   # fr(xi) + fi(xr)  (bias: b1r + b1i)

    # ----- complex_relu, laid out as [h_re | h_im] on lanes (128-aligned concat) -----
    g = jnp.maximum(jnp.concatenate([h_re, h_im], axis=1), 0.0)        # [8, 512]

    # ----- fc2 = ComplexLinear(256, 10): one block-matrix matmul instead of four -----
    y = jnp.dot(g.astype(jnp.bfloat16), w2_ref[...],
                preferred_element_type=jnp.float32) + b2_ref[...]      # [8, 20]

    # ----- complex_softmax (component-wise, over feature dim); single fused store --
    o_ref[...] = jnp.concatenate(
        [_softmax_lastdim(y[:, :D_OUT]), _softmax_lastdim(y[:, D_OUT:])], axis=1)


def prep_params(params):
    """Offline prep: concat real/imag pairs, pad K, int8-quantize w1, bf16 w2."""
    w1r, w1i, b1r, b1i, w2r, w2i, b2r, b2i = params
    # fc1: N-concat, per-column symmetric int8 quantization, zero-pad K 784 -> 896.
    w1 = jnp.concatenate([w1r, w1i], axis=1)                          # [784, 512]
    s1 = jnp.maximum(jnp.max(jnp.abs(w1), axis=0, keepdims=True), 1e-8) / 127.0
    w1_q = jnp.clip(jnp.round(w1 / s1), -127.0, 127.0).astype(jnp.int8)
    w1_q = jnp.pad(w1_q, ((0, K_PAD - D_IN), (0, 0)))                 # [896, 512] i8
    b1 = jnp.concatenate([b1r, b1i], axis=1)                          # [1, 512]
    # fc2: real block-matrix form of the complex matmul; effective biases folded in.
    w2 = jnp.concatenate(
        [jnp.concatenate([w2r, w2i], axis=1),
         jnp.concatenate([-w2i, w2r], axis=1)], axis=0).astype(jnp.bfloat16)  # [512,20]
    b2 = jnp.concatenate([b2r - b2i, b2r + b2i], axis=1)              # [1, 20]
    return w1_q, s1, b1, w2, b2


def complexnet_forward(xr, xi, prepped):
    """xr, xi: float32 [B, 1, 28, 28] (real / imag parts of the complex input)."""
    b = xr.shape[0]
    # ComplexFlatten(start_dim=1); pad each component to an 8-row sublane tile,
    # stack re over im on M, zero-pad K to 896, cast to bf16 (fused with the pad).
    xr_p = jnp.pad(xr.reshape(b, -1), ((0, R_PAD - b), (0, K_PAD - D_IN)))
    xi_p = jnp.pad(xi.reshape(b, -1), ((0, R_PAD - b), (0, K_PAD - D_IN)))
    x = jnp.concatenate([xr_p, xi_p], axis=0).astype(jnp.bfloat16)    # [16, 896] bf16

    w1_q, s1, b1, w2, b2 = prepped
    vmem = pl.BlockSpec(memory_space=pltpu.MemorySpace.VMEM)

    out = pl.pallas_call(
        complexnet_kernel,
        in_specs=[vmem, vmem, vmem, vmem, vmem, vmem],
        out_specs=vmem,
        out_shape=jax.ShapeDtypeStruct((R_PAD, 2 * D_OUT), jnp.float32),
    )(x, w1_q, s1, b1, w2, b2)
    return out[:b, :D_OUT], out[:b, D_OUT:]


def init_params(key):
    """Deterministic synthetic parameters (shapes of ComplexLinear(784,256), (256,10))."""
    ks = jax.random.split(key, 8)
    def lin(kw, kb, fan_in, fan_out):
        bound = 1.0 / jnp.sqrt(fan_in)
        w = jax.random.uniform(kw, (fan_in, fan_out), jnp.float32, -bound, bound)
        bias = jax.random.uniform(kb, (1, fan_out), jnp.float32, -bound, bound)
        return w, bias
    w1r, b1r = lin(ks[0], ks[1], D_IN, D_H)   # fc1.fc_r
    w1i, b1i = lin(ks[2], ks[3], D_IN, D_H)   # fc1.fc_i
    w2r, b2r = lin(ks[4], ks[5], D_H, D_OUT)  # fc2.fc_r
    w2i, b2i = lin(ks[6], ks[7], D_H, D_OUT)  # fc2.fc_i
    return (w1r, w1i, b1r, b1i, w2r, w2i, b2r, b2i)


if __name__ == "__main__":
    key = jax.random.PRNGKey(0)
    k_xr, k_xi, k_p = jax.random.split(key, 3)

    # Complex input: MNIST-like shape [B, 1, 28, 28] (784 features after flatten).
    xr = jax.random.normal(k_xr, (B, 1, 28, 28), jnp.float32)
    xi = jax.random.normal(k_xi, (B, 1, 28, 28), jnp.float32)

    prepped = prep_params(init_params(k_p))

    out_re, out_im = complexnet_forward(xr, xi, prepped)
    jax.block_until_ready((out_re, out_im))

    # Sanity: component-wise softmax rows sum to ~1 (exact reciprocal now used;
    # tolerance only covers f32 exp/divide rounding).
    assert out_re.shape == (B, D_OUT) and out_im.shape == (B, D_OUT)
    assert jnp.allclose(jnp.sum(out_re, axis=-1), 1.0, atol=1e-3)
    assert jnp.allclose(jnp.sum(out_im, axis=-1), 1.0, atol=1e-3)
    assert bool(jnp.all(jnp.isfinite(out_re))) and bool(jnp.all(jnp.isfinite(out_im)))

    print("KERNEL_OK")
</pallas_src>

<mosaic_0001>
module attributes {stable_mosaic.version = 11 : i64} {
  func.func @complexnet_kernel(%arg0: memref<16x896xbf16, #tpu.memory_space<vmem>>, %arg1: memref<896x512xi8, #tpu.memory_space<vmem>>, %arg2: memref<1x512xf32, #tpu.memory_space<vmem>>, %arg3: memref<1x512xf32, #tpu.memory_space<vmem>>, %arg4: memref<512x20xbf16, #tpu.memory_space<vmem>>, %arg5: memref<1x20xf32, #tpu.memory_space<vmem>>, %arg6: memref<8x20xf32, #tpu.memory_space<vmem>>) attributes {dimension_semantics = [], scalar_prefetch = 0 : i64, scratch_operands = 0 : i64, tpu.core_type = #tpu.core_type<tc>} {
    %c0 = arith.constant 0 : index
    %c0_0 = arith.constant 0 : index
    %0 = vector.load %arg0[%c0, %c0_0] : memref<16x896xbf16, #tpu.memory_space<vmem>>, vector<16x896xbf16>
    %c0_1 = arith.constant 0 : index
    %c0_2 = arith.constant 0 : index
    %1 = vector.load %arg1[%c0_1, %c0_2] : memref<896x512xi8, #tpu.memory_space<vmem>>, vector<896x512xi8>
    %2 = arith.sitofp %1 : vector<896x512xi8> to vector<896x512xf32>
    %3 = arith.truncf %2 : vector<896x512xf32> to vector<896x512xbf16>
    %cst = arith.constant dense<0.000000e+00> : vector<16x512xf32>
    %4 = tpu.matmul %0, %3, %cst {dimension_numbers = #tpu.dot_dimension_numbers<[1], [0], [0], [1], [0, 0, 1, 1], [], []>} : vector<16x896xbf16>, vector<896x512xbf16>, vector<16x512xf32> -> vector<16x512xf32>
    %c0_3 = arith.constant 0 : index
    %c0_4 = arith.constant 0 : index
    %5 = vector.load %arg2[%c0_3, %c0_4] : memref<1x512xf32, #tpu.memory_space<vmem>>, vector<1x512xf32>
    %6 = vector.broadcast %5 : vector<1x512xf32> to vector<16x512xf32>
    %7 = arith.mulf %4, %6 : vector<16x512xf32>
    %c0_5 = arith.constant 0 : index
    %c0_6 = arith.constant 0 : index
    %8 = vector.load %arg3[%c0_5, %c0_6] : memref<1x512xf32, #tpu.memory_space<vmem>>, vector<1x512xf32>
    %9 = vector.broadcast %8 : vector<1x512xf32> to vector<16x512xf32>
    %10 = arith.addf %7, %9 : vector<16x512xf32>
    %11 = vector.extract_strided_slice %10 {offsets = [0, 0], sizes = [8, 512], strides = [1, 1]} : vector<16x512xf32> to vector<8x512xf32>
    %12 = vector.extract_strided_slice %10 {offsets = [8, 0], sizes = [8, 512], strides = [1, 1]} : vector<16x512xf32> to vector<8x512xf32>
    %13 = vector.extract_strided_slice %11 {offsets = [0, 0], sizes = [8, 256], strides = [1, 1]} : vector<8x512xf32> to vector<8x256xf32>
    %14 = vector.extract_strided_slice %12 {offsets = [0, 256], sizes = [8, 256], strides = [1, 1]} : vector<8x512xf32> to vector<8x256xf32>
    %15 = arith.subf %13, %14 : vector<8x256xf32>
    %16 = vector.extract_strided_slice %12 {offsets = [0, 0], sizes = [8, 256], strides = [1, 1]} : vector<8x512xf32> to vector<8x256xf32>
    %17 = vector.extract_strided_slice %11 {offsets = [0, 256], sizes = [8, 256], strides = [1, 1]} : vector<8x512xf32> to vector<8x256xf32>
    %18 = arith.addf %16, %17 : vector<8x256xf32>
    %19 = tpu.concatenate %15, %18 in 1 : vector<8x256xf32>, vector<8x256xf32> -> vector<8x512xf32>
    %cst_7 = arith.constant 0.000000e+00 : f32
    %20 = vector.broadcast %cst_7 : f32 to vector<8x512xf32>
    %21 = arith.maximumf %19, %20 : vector<8x512xf32>
    %22 = arith.truncf %21 : vector<8x512xf32> to vector<8x512xbf16>
    %c0_8 = arith.constant 0 : index
    %c0_9 = arith.constant 0 : index
    %23 = vector.load %arg4[%c0_8, %c0_9] : memref<512x20xbf16, #tpu.memory_space<vmem>>, vector<512x20xbf16>
    %cst_10 = arith.constant dense<0.000000e+00> : vector<8x20xf32>
    %24 = tpu.matmul %22, %23, %cst_10 {dimension_numbers = #tpu.dot_dimension_numbers<[1], [0], [0], [1], [0, 0, 1, 1], [], []>} : vector<8x512xbf16>, vector<512x20xbf16>, vector<8x20xf32> -> vector<8x20xf32>
    %c0_11 = arith.constant 0 : index
    %c0_12 = arith.constant 0 : index
    %25 = vector.load %arg5[%c0_11, %c0_12] : memref<1x20xf32, #tpu.memory_space<vmem>>, vector<1x20xf32>
    %26 = vector.broadcast %25 : vector<1x20xf32> to vector<8x20xf32>
    %27 = arith.addf %24, %26 : vector<8x20xf32>
    %28 = vector.extract_strided_slice %27 {offsets = [0, 0], sizes = [8, 10], strides = [1, 1]} : vector<8x20xf32> to vector<8x10xf32>
    %cst_13 = arith.constant dense<0xFF800000> : vector<8xf32>
    %29 = vector.multi_reduction <maximumf>, %28, %cst_13 [1] : vector<8x10xf32> to vector<8xf32>
    %30 = vector.shape_cast %29 : vector<8xf32> to vector<8x1xf32>
    %31 = vector.broadcast %30 : vector<8x1xf32> to vector<8x10xf32>
    %32 = arith.subf %28, %31 : vector<8x10xf32>
    %33 = math.exp %32 : vector<8x10xf32>
    %cst_14 = arith.constant dense<0.000000e+00> : vector<8xf32>
    %34 = vector.multi_reduction <add>, %33, %cst_14 [1] : vector<8x10xf32> to vector<8xf32>
    %35 = vector.shape_cast %34 : vector<8xf32> to vector<8x1xf32>
    %36 = vector.broadcast %35 : vector<8x1xf32> to vector<8x10xf32>
    %37 = arith.divf %33, %36 : vector<8x10xf32>
    %38 = vector.extract_strided_slice %27 {offsets = [0, 10], sizes = [8, 10], strides = [1, 1]} : vector<8x20xf32> to vector<8x10xf32>
    %cst_15 = arith.constant dense<0xFF800000> : vector<8xf32>
    %39 = vector.multi_reduction <maximumf>, %38, %cst_15 [1] : vector<8x10xf32> to vector<8xf32>
    %40 = vector.shape_cast %39 : vector<8xf32> to vector<8x1xf32>
    %41 = vector.broadcast %40 : vector<8x1xf32> to vector<8x10xf32>
    %42 = arith.subf %38, %41 : vector<8x10xf32>
    %43 = math.exp %42 : vector<8x10xf32>
    %cst_16 = arith.constant dense<0.000000e+00> : vector<8xf32>
    %44 = vector.multi_reduction <add>, %43, %cst_16 [1] : vector<8x10xf32> to vector<8xf32>
    %45 = vector.shape_cast %44 : vector<8xf32> to vector<8x1xf32>
    %46 = vector.broadcast %45 : vector<8x1xf32> to vector<8x10xf32>
    %47 = arith.divf %43, %46 : vector<8x10xf32>
    %48 = tpu.concatenate %37, %47 in 1 : vector<8x10xf32>, vector<8x10xf32> -> vector<8x20xf32>
    %c0_17 = arith.constant 0 : index
    %c0_18 = arith.constant 0 : index
    %49 = vector.load %arg6[%c0_17, %c0_18] : memref<8x20xf32, #tpu.memory_space<vmem>>, vector<8x20xf32>
    tpu.vector_store %arg6[%c0_17, %c0_18], %48 {strides = array<i32>} : memref<8x20xf32, #tpu.memory_space<vmem>>, vector<8x20xf32>,
    return
  }
}

</mosaic_0001>

<bundles_post_ra>
// kernel: tpu_custom_call.1
= control target key start
LH: loop header
LB: loop body
LE: loop exit
PB: predicated region body
PF: predicated region fallthrough
CT: control target
= control target key end

     0   :  { %11 = vsyncpa [#allocation3], 0  ;;  %s1615_s0 = inlined_call_operand.vmem [shape: bf16[16,896], index: 0, kind: input, shape index: {}]   ;;  %s1616_s1 = inlined_call_operand.hbm [shape: s8[896,512], index: 1, kind: input, shape index: {}]   ;;  %s1617_s2 = inlined_call_operand.vmem [shape: f32[1,512], index: 2, kind: input, shape index: {}]   ;;  %s1618_s3 = inlined_call_operand.vmem [shape: f32[1,512], index: 3, kind: input, shape index: {}]   ;;  %s1619_s4 = inlined_call_operand.vmem [shape: bf16[512,20], index: 4, kind: input, shape index: {}]   ;;  %s1620_s5 = inlined_call_operand.vmem [shape: f32[1,20], index: 5, kind: input, shape index: {}]   ;;  %s1621_s6 = inlined_call_operand.hbm [shape: f32[8,20], index: 6, kind: output, shape index: {}]  }
   0x1   :  { %12 = vsyncpa [#allocation4], 0  ;;  %s1408_s21 = smov [#allocation2]  }
   0x2   :  { %s20_s22 = sshll.u32 %s1408_s21, 4  ;;  %s21_s22 = int_to_ptr.vmem [resolvable:$true] %s20_s22 }
   0x3   :  { %s1372_s23 = scalar_lea.vmem %s21_s22, 14336  ;;  %p1377_p1 = scmp.lt.s32.totalorder %s21_s22, %s21_s22 }
   0x4   :  { %p1373_p0 = scmp.ne.s32.totalorder %s21_s22, %s1372_s23  ;;  %p1378_p2 = scmp.lt.s32.totalorder %s1372_s23, %s1372_s23 }
   0x6   :  { %p1379_p3 = por %p1378_p2, %p1377_p1 }
   0x8   :  { %p1380_p4 = pnand %p1379_p3, %p1373_p0 }
   0xa   :  { %1383 = shalt.err (!%p1380_p4)
}
   0xb   :  { %s1409_s24 = smov 512   ;;  %s1410_s25 = smov 32  }
   0xc   :  { %26 = dma.hbm_to_vmem [thread:$0]  %s1616_s1, 14336, %s21_s22, [#allocation3], %s1409_s24, %s1409_s24, %s1410_s25  }
   0xd   :  { %1404 = dma.done.wait [#allocation3], 14336  }
   0xe   :  { %1405 = vsyncadd [#allocation3], 4294952960  ;;  %v60_v0 = vld [vmem:[#allocation2 + $0x68] sm:$0xff]  ;;  %v59_v2 = vld [vmem:[#allocation2 + $0x60] sm:$0xff]  ;;  %vm1190_vm0 = vcmask 162896   ;;  %vm1178_vm1 = vcmask 80896  }
   0xf   :  { %v92_v1 = vld [vmem:[#allocation2 + $0x168] sm:$0xff]  ;;  %v184_v3 = vunpack.c.l.s8.bf16 %v60_v0  ;;  %v188_v4 = vunpack.c.h.s8.bf16 %v60_v0  ;;  %v91_v7 = vld [vmem:[#allocation2 + $0x160] sm:$0xff]  ;;  %v187_v8 = vunpack.c.h.s8.bf16 %v59_v2  ;;  %v183_v12 = vunpack.c.l.s8.bf16 %v59_v2  ;;  %s1413_s30 = smov [#allocation5]  }
  0x10   :  { %v248_v5 = vunpack.c.l.s8.bf16 %v92_v1  ;;  %v252_v6 = vunpack.c.h.s8.bf16 %v92_v1  ;;  %v251_v9 = vunpack.c.h.s8.bf16 %v91_v7  ;;  %v56_v10 = vld [vmem:[#allocation2 + $0x48] sm:$0xff]  ;;  %v247_v13 = vunpack.c.l.s8.bf16 %v91_v7  ;;  %v55_v16 = vld [vmem:[#allocation2 + $0x40] sm:$0xff]  ;;  %s1215_s7 = sshll.u32 %s1413_s30, 4  ;;  %s1216_s7 = int_to_ptr.vmem [resolvable:$true] %s1215_s7 }
  0x11   :  { %v88_v11 = vld [vmem:[#allocation2 + $0x148] sm:$0xff]  ;;  %419 = vmatprep.subr.bf16.mxu0 %v188_v4  ;;  %v180_v14 = vunpack.c.h.s8.bf16 %v56_v10  ;;  %v87_v17 = vld [vmem:[#allocation2 + $0x140] sm:$0xff]  ;;  %v179_v18 = vunpack.c.h.s8.bf16 %v55_v16  ;;  %v176_v20 = vunpack.c.l.s8.bf16 %v56_v10  ;;  %v175_v25 = vunpack.c.l.s8.bf16 %v55_v16  ;;  %s1384_s8 = scalar_lea.vmem %s1216_s7, 128  ;;  %p1389_p6 = scmp.lt.s32.totalorder %s1216_s7, %s1216_s7 }
  0x12   :  { %462 = vmatprep.subr.bf16.mxu1 %v252_v6  ;;  %420 = vmatpush1.bf16.msra.mxu0 %v187_v8  ;;  %v244_v15 = vunpack.c.h.s8.bf16 %v88_v11  ;;  %v243_v19 = vunpack.c.h.s8.bf16 %v87_v17  ;;  %v240_v21 = vunpack.c.l.s8.bf16 %v88_v11  ;;  %v52_v22 = vld [vmem:[#allocation2 + $0x28] sm:$0xff]  ;;  %v1455_v24 = vld [vmem:[%s1615_s0 + $0x4] ss:$28 sps:$4 sm:$0xff]   ;;  %v239_v26 = vunpack.c.l.s8.bf16 %v87_v17  ;;  %p1385_p5 = scmp.ne.s32.totalorder %s1216_s7, %s1384_s8  ;;  %p1390_p7 = scmp.lt.s32.totalorder %s1384_s8, %s1384_s8 }
  0x13   :  { %463 = vmatpush1.bf16.msra.mxu1 %v251_v9  ;;  %421 = vmatprep.subr.bf16.mxu0 %v184_v3  ;;  %v84_v23 = vld [vmem:[#allocation2 + $0x128] sm:$0xff]  ;;  %v172_v27 = vunpack.c.h.s8.bf16 %v52_v22  ;;  %v51_v29 = vld [vmem:[#allocation2 + $0x20] sm:$0xff]  ;;  %v168_v34 = vunpack.c.l.s8.bf16 %v52_v22  ;;  %vm1207_vm2 = vcmask 162816  }
  0x14   :  { %464 = vmatprep.subr.bf16.mxu1 %v248_v5  ;;  %v236_v28 = vunpack.c.h.s8.bf16 %v84_v23  ;;  %v83_v30 = vld [vmem:[#allocation2 + $0x120] sm:$0xff]  ;;  %v1460_v31 = vld [vmem:[%s1615_s0 + $0xc] ss:$28 sps:$4 sm:$0xff]   ;;  %451 = vmatprep.mubr.bf16.mxu0 %v1455_v24  ;;  %v171_v32 = vunpack.c.h.s8.bf16 %v51_v29  ;;  %v232_v35 = vunpack.c.l.s8.bf16 %v84_v23  ;;  %v167_v38 = vunpack.c.l.s8.bf16 %v51_v29  ;;  %p1391_p8 = por %p1390_p7, %p1389_p6 }
  0x15   :  { %494 = vmatprep.mubr.bf16.mxu1 %v1460_v31  ;;  %v235_v33 = vunpack.c.h.s8.bf16 %v83_v30  ;;  %v48_v36 = vld [vmem:[#allocation2 + $0x8] sm:$0xff]  ;;  %v231_v39 = vunpack.c.l.s8.bf16 %v83_v30  ;;  %v47_v42 = vld [vmem:[#allocation2] sm:$0xff] }
  0x16   :  { %422 = vmatpush1.bf16.msra.mxu0 %v183_v12  ;;  %v80_v37 = vld [vmem:[#allocation2 + $0x108] sm:$0xff]  ;;  %v164_v40 = vunpack.c.h.s8.bf16 %v48_v36  ;;  %v79_v43 = vld [vmem:[#allocation2 + $0x100] sm:$0xff]  ;;  %v163_v44 = vunpack.c.h.s8.bf16 %v47_v42  ;;  %v160_v46 = vunpack.c.l.s8.bf16 %v48_v36  ;;  %v159_v50 = vunpack.c.l.s8.bf16 %v47_v42  ;;  %p1392_p9 = pnand %p1391_p8, %p1385_p5 }
  0x17   :  { %465 = vmatpush1.bf16.msra.mxu1 %v247_v13  ;;  %423 = vmatprep.subr.bf16.mxu0 %v180_v14  ;;  %v228_v41 = vunpack.c.h.s8.bf16 %v80_v37  ;;  %v227_v45 = vunpack.c.h.s8.bf16 %v79_v43  ;;  %v224_v47 = vunpack.c.l.s8.bf16 %v80_v37  ;;  %v76_v48 = vld [vmem:[#allocation2 + $0xe8] sm:$0xff]  ;;  %v223_v51 = vunpack.c.l.s8.bf16 %v79_v43  ;;  %v75_v54 = vld [vmem:[#allocation2 + $0xe0] sm:$0xff] }
  0x18   :  { %466 = vmatprep.subr.bf16.mxu1 %v244_v15  ;;  %v108_v49 = vld [vmem:[#allocation2 + $0x1e8] sm:$0xff]  ;;  %v220_v52 = vunpack.c.h.s8.bf16 %v76_v48  ;;  %v107_v55 = vld [vmem:[#allocation2 + $0x1e0] sm:$0xff]  ;;  %v219_v56 = vunpack.c.h.s8.bf16 %v75_v54  ;;  %v216_v58 = vunpack.c.l.s8.bf16 %v76_v48  ;;  %v215_v0 = vunpack.c.l.s8.bf16 %v75_v54 }
  0x19   :  { %v284_v53 = vunpack.c.h.s8.bf16 %v108_v49  ;;  %v283_v57 = vunpack.c.h.s8.bf16 %v107_v55  ;;  %v280_v59 = vunpack.c.l.s8.bf16 %v108_v49  ;;  %v72_v60 = vld [vmem:[#allocation2 + $0xc8] sm:$0xff]  ;;  %v71_v62 = vld [vmem:[#allocation2 + $0xc0] sm:$0xff]  ;;  %v279_v1 = vunpack.c.l.s8.bf16 %v107_v55 }
  0x1a   :  { %424 = vmatpush1.bf16.msra.mxu0 %v179_v18  ;;  %v104_v61 = vld [vmem:[#allocation2 + $0x1c8] sm:$0xff]  ;;  %v103_v63 = vld [vmem:[#allocation2 + $0x1c0] sm:$0xff]  ;;  %v212_v2 = vunpack.c.h.s8.bf16 %v72_v60  ;;  %v211_v4 = vunpack.c.h.s8.bf16 %v71_v62  ;;  %v208_v6 = vunpack.c.l.s8.bf16 %v72_v60  ;;  %v207_v12 = vunpack.c.l.s8.bf16 %v71_v62 }
  0x1b   :  { %467 = vmatpush1.bf16.msra.mxu1 %v243_v19  ;;  %425 = vmatprep.subr.bf16.mxu0 %v176_v20  ;;  %v276_v3 = vunpack.c.h.s8.bf16 %v104_v61  ;;  %v275_v5 = vunpack.c.h.s8.bf16 %v103_v63  ;;  %v272_v7 = vunpack.c.l.s8.bf16 %v104_v61  ;;  %v68_v8 = vld [vmem:[#allocation2 + $0xa8] sm:$0xff]  ;;  %v67_v10 = vld [vmem:[#allocation2 + $0xa0] sm:$0xff]  ;;  %v271_v13 = vunpack.c.l.s8.bf16 %v103_v63 }
  0x1c   :  { %468 = vmatprep.subr.bf16.mxu1 %v240_v21  ;;  %v100_v9 = vld [vmem:[#allocation2 + $0x1a8] sm:$0xff]  ;;  %v99_v11 = vld [vmem:[#allocation2 + $0x1a0] sm:$0xff]  ;;  %v204_v14 = vunpack.c.h.s8.bf16 %v68_v8  ;;  %v203_v16 = vunpack.c.h.s8.bf16 %v67_v10  ;;  %v200_v18 = vunpack.c.l.s8.bf16 %v68_v8 }
  0x1d   :  { %v268_v15 = vunpack.c.h.s8.bf16 %v100_v9  ;;  %v267_v17 = vunpack.c.h.s8.bf16 %v99_v11  ;;  %v264_v19 = vunpack.c.l.s8.bf16 %v100_v9  ;;  %v64_v20 = vld [vmem:[#allocation2 + $0x88] sm:$0xff]  ;;  %v63_v22 = vld [vmem:[#allocation2 + $0x80] sm:$0xff] }
  0x1e   :  { %426 = vmatpush1.bf16.msra.mxu0 %v175_v25  ;;  %v96_v21 = vld [vmem:[#allocation2 + $0x188] sm:$0xff]  ;;  %v95_v23 = vld [vmem:[#allocation2 + $0x180] sm:$0xff]  ;;  %v199_v25 = vunpack.c.l.s8.bf16 %v67_v10  ;;  %v195_v29 = vunpack.c.h.s8.bf16 %v63_v22  ;;  %v191_v36 = vunpack.c.l.s8.bf16 %v63_v22 }
  0x1f   :  { %469 = vmatpush1.bf16.msra.mxu1 %v239_v26  ;;  %427 = vmatprep.subr.bf16.mxu0 %v172_v27  ;;  %v263_v26 = vunpack.c.l.s8.bf16 %v99_v11  ;;  %v196_v27 = vunpack.c.h.s8.bf16 %v64_v20  ;;  %v259_v30 = vunpack.c.h.s8.bf16 %v95_v23  ;;  %v255_v37 = vunpack.c.l.s8.bf16 %v95_v23  ;;  %v1467_v42 = vld [vmem:[%s1615_s0] ss:$28 sps:$4 sm:$0xff]   ;;  %v1472_v43 = vld [vmem:[%s1615_s0 + $0x8] ss:$28 sps:$4 sm:$0xff]  }
  0x20   :  { %470 = vmatprep.subr.bf16.mxu1 %v236_v28  ;;  %v260_v28 = vunpack.c.h.s8.bf16 %v96_v21  ;;  %v120_v48 = vld [vmem:[#allocation2 + $0x248] sm:$0xff]  ;;  %v119_v55 = vld [vmem:[#allocation2 + $0x240] sm:$0xff]  ;;  %v62_v23 = vld [vmem:[#allocation2 + $0x78] sm:$0xff] }
  0x21   :  { %v152_v49 = vld [vmem:[#allocation2 + $0x348] sm:$0xff]  ;;  %v304_v60 = vunpack.c.l.s8.bf16 %v120_v48 }
  0x22   :  { %428 = vmatpush1.bf16.msra.mxu0 %v171_v32  ;;  %v192_v32 = vunpack.c.l.s8.bf16 %v64_v20  ;;  %v372_v54 = vunpack.c.h.s8.bf16 %v152_v49  ;;  %v368_v61 = vunpack.c.l.s8.bf16 %v152_v49  ;;  %v116_v62 = vld [vmem:[#allocation2 + $0x228] sm:$0xff] }
  0x23   :  { %471 = vmatpush1.bf16.msra.mxu1 %v235_v33  ;;  %429 = vmatprep.subr.bf16.mxu0 %v168_v34  ;;  %v256_v33 = vunpack.c.l.s8.bf16 %v96_v21  ;;  %v124_v34 = vld [vmem:[#allocation2 + $0x268] sm:$0xff]  ;;  %v296_v8 = vunpack.c.l.s8.bf16 %v116_v62 }
  0x24   :  { %472 = vmatprep.subr.bf16.mxu1 %v232_v35  ;;  %v156_v35 = vld [vmem:[#allocation2 + $0x368] sm:$0xff] }
  0x25   :  { %v148_v63 = vld [vmem:[#allocation2 + $0x328] sm:$0xff] }
  0x26   :  { %430 = vmatpush1.bf16.msra.mxu0 %v167_v38  ;;  %v316_v38 = vunpack.c.h.s8.bf16 %v124_v34  ;;  %v360_v9 = vunpack.c.l.s8.bf16 %v148_v63  ;;  %v112_v10 = vld [vmem:[#allocation2 + $0x208] sm:$0xff] }
  0x27   :  { %473 = vmatpush1.bf16.msra.mxu1 %v231_v39  ;;  %431 = vmatprep.subr.bf16.mxu0 %v164_v40  ;;  %v380_v39 = vunpack.c.h.s8.bf16 %v156_v35  ;;  %v123_v40 = vld [vmem:[#allocation2 + $0x260] sm:$0xff]  ;;  %v144_v11 = vld [vmem:[#allocation2 + $0x308] sm:$0xff]  ;;  %v288_v20 = vunpack.c.l.s8.bf16 %v112_v10 }
  0x28   :  { %474 = vmatprep.subr.bf16.mxu1 %v228_v41  ;;  %v155_v41 = vld [vmem:[#allocation2 + $0x360] sm:$0xff]  ;;  %v352_v21 = vunpack.c.l.s8.bf16 %v144_v11  ;;  %v140_v22 = vld [vmem:[#allocation2 + $0x2e8] sm:$0xff] }
  0x2a   :  { %432 = vmatpush1.bf16.msra.mxu0 %v163_v44  ;;  %v315_v44 = vunpack.c.h.s8.bf16 %v123_v40 }
  0x2b   :  { %475 = vmatpush1.bf16.msra.mxu1 %v227_v45  ;;  %433 = vmatprep.subr.bf16.mxu0 %v160_v46  ;;  %v379_v45 = vunpack.c.h.s8.bf16 %v155_v41  ;;  %v312_v46 = vunpack.c.l.s8.bf16 %v124_v34 }
  0x2c   :  { %476 = vmatprep.subr.bf16.mxu1 %v224_v47  ;;  %v376_v47 = vunpack.c.l.s8.bf16 %v156_v35  ;;  %v344_v35 = vunpack.c.l.s8.bf16 %v140_v22 }
  0x2e   :  { %434 = vmatpush1.bf16.msra.mxu0 %v159_v50  ;;  %v1477_v50 = vld [vmem:[%s1615_s0 + $0x14] ss:$28 sps:$4 sm:$0xff]  }
  0x2f   :  { %477 = vmatpush1.bf16.msra.mxu1 %v223_v51  ;;  %435 = vmatprep.subr.bf16.mxu0 %v220_v52  ;;  %v311_v51 = vunpack.c.l.s8.bf16 %v123_v40  ;;  %v375_v52 = vunpack.c.l.s8.bf16 %v155_v41 }
  0x30   :  { %478 = vmatprep.subr.bf16.mxu1 %v284_v53  ;;  %v308_v53 = vunpack.c.h.s8.bf16 %v120_v48 }
  0x32   :  { %436 = vmatpush2.bf16.msra.mxu0 %v219_v56  ;;  %v151_v56 = vld [vmem:[#allocation2 + $0x340] sm:$0xff] }
  0x33   :  { %479 = vmatpush2.bf16.msra.mxu1 %v283_v57  ;;  %437 = vmatprep.subr.bf16.mxu0 %v216_v58  ;;  %v1411_v57 = vmov 0   ;;  %v307_v58 = vunpack.c.h.s8.bf16 %v119_v55 }
  0x34   :  { %480 = vmatprep.subr.bf16.mxu1 %v280_v59  ;;  %v371_v59 = vunpack.c.h.s8.bf16 %v151_v56 }
  0x36   :  { %438 = vmatpush2.bf16.msra.mxu0 %v215_v0  ;;  %v303_v0 = vunpack.c.l.s8.bf16 %v119_v55 }
  0x37   :  { %481 = vmatpush2.bf16.msra.mxu1 %v279_v1  ;;  %439 = vmatprep.subr.bf16.mxu0 %v212_v2  ;;  %v367_v1 = vunpack.c.l.s8.bf16 %v151_v56  ;;  %v300_v2 = vunpack.c.h.s8.bf16 %v116_v62 }
  0x38   :  { %482 = vmatprep.subr.bf16.mxu1 %v276_v3  ;;  %v364_v3 = vunpack.c.h.s8.bf16 %v148_v63 }
  0x3a   :  { %440 = vmatpush2.bf16.msra.mxu0 %v211_v4  ;;  %v115_v4 = vld [vmem:[#allocation2 + $0x220] sm:$0xff] }
  0x3b   :  { %483 = vmatpush2.bf16.msra.mxu1 %v275_v5  ;;  %441 = vmatprep.subr.bf16.mxu0 %v208_v6  ;;  %v147_v5 = vld [vmem:[#allocation2 + $0x320] sm:$0xff]  ;;  %v299_v6 = vunpack.c.h.s8.bf16 %v115_v4 }
  0x3c   :  { %484 = vmatprep.subr.bf16.mxu1 %v272_v7  ;;  %v363_v7 = vunpack.c.h.s8.bf16 %v147_v5 }
  0x3e   :  { %442 = vmatpush2.bf16.msra.mxu0 %v207_v12  ;;  %v295_v12 = vunpack.c.l.s8.bf16 %v115_v4 }
  0x3f   :  { %485 = vmatpush2.bf16.msra.mxu1 %v271_v13  ;;  %443 = vmatprep.subr.bf16.mxu0 %v204_v14  ;;  %v359_v13 = vunpack.c.l.s8.bf16 %v147_v5  ;;  %v292_v14 = vunpack.c.h.s8.bf16 %v112_v10 }
  0x40   :  { %486 = vmatprep.subr.bf16.mxu1 %v268_v15  ;;  %v356_v15 = vunpack.c.h.s8.bf16 %v144_v11 }
  0x42   :  { %444 = vmatpush2.bf16.msra.mxu0 %v203_v16  ;;  %v111_v16 = vld [vmem:[#allocation2 + $0x200] sm:$0xff] }
  0x43   :  { %487 = vmatpush2.bf16.msra.mxu1 %v267_v17  ;;  %445 = vmatprep.subr.bf16.mxu0 %v200_v18  ;;  %v143_v17 = vld [vmem:[#allocation2 + $0x300] sm:$0xff]  ;;  %v291_v18 = vunpack.c.h.s8.bf16 %v111_v16 }
  0x44   :  { %488 = vmatprep.subr.bf16.mxu1 %v264_v19  ;;  %v355_v19 = vunpack.c.h.s8.bf16 %v143_v17 }
  0x46   :  { %446 = vmatpush2.bf16.msra.mxu0 %v199_v25  ;;  %v287_v25 = vunpack.c.l.s8.bf16 %v111_v16 }
  0x47   :  { %489 = vmatpush2.bf16.msra.mxu1 %v263_v26  ;;  %447 = vmatprep.subr.bf16.mxu0 %v196_v27  ;;  %v351_v26 = vunpack.c.l.s8.bf16 %v143_v17  ;;  %v348_v27 = vunpack.c.h.s8.bf16 %v140_v22 }
  0x48   :  { %490 = vmatprep.subr.bf16.mxu1 %v260_v28  ;;  %v190_v28 = vunpack.c.h.s8.bf16 %v62_v23 }
  0x4a   :  { %448 = vmatpush2.bf16.msra.mxu0 %v195_v29  ;;  %v139_v29 = vld [vmem:[#allocation2 + $0x2e0] sm:$0xff] }
  0x4b   :  { %491 = vmatpush2.bf16.msra.mxu1 %v259_v30  ;;  %449 = vmatprep.subr.bf16.mxu0 %v192_v32  ;;  %v61_v30 = vld [vmem:[#allocation2 + $0x70] sm:$0xff] }
  0x4c   :  { %492 = vmatprep.subr.bf16.mxu1 %v256_v33  ;;  %v1486_v32 = vld [vmem:[%s1615_s0 + $0x18] ss:$28 sps:$4 sm:$0xff]   ;;  %v347_v33 = vunpack.c.h.s8.bf16 %v139_v29  ;;  %v189_v34 = vunpack.c.h.s8.bf16 %v61_v30  ;;  %v185_v40 = vunpack.c.l.s8.bf16 %v61_v30 }
  0x4e   :  { %450 = vmatpush2.bf16.msra.mxu0 %v191_v36  ;;  %v186_v36 = vunpack.c.l.s8.bf16 %v62_v23 }
  0x4f   :  { %493 = vmatpush2.bf16.msra.mxu1 %v255_v37  ;;  %505 = vmatprep.subr.bf16.mxu0 %v316_v38  ;;  %v136_v37 = vld [vmem:[#allocation2 + $0x2c8] sm:$0xff]  ;;  %v58_v38 = vld [vmem:[#allocation2 + $0x58] sm:$0xff] }
  0x50   :  { %548 = vmatprep.subr.bf16.mxu1 %v380_v39  ;;  %v343_v39 = vunpack.c.l.s8.bf16 %v139_v29  ;;  %v340_v41 = vunpack.c.h.s8.bf16 %v136_v37  ;;  %v336_v49 = vunpack.c.l.s8.bf16 %v136_v37 }
  0x51   :  { %452 = vmatmul.mubr.bf16.vlgmr.msra.gmra.mxu0 %v1467_v42 }
  0x52   :  { %495 = vmatmul.mubr.bf16.vlgmr.msra.gmra.mxu1 %v1472_v43  ;;  %506 = vmatpush1.bf16.msra.mxu0 %v315_v44  ;;  %v182_v44 = vunpack.c.h.s8.bf16 %v58_v38 }
  0x53   :  { %549 = vmatpush1.bf16.msra.mxu1 %v379_v45  ;;  %507 = vmatprep.subr.bf16.mxu0 %v312_v46  ;;  %v135_v45 = vld [vmem:[#allocation2 + $0x2c0] sm:$0xff]  ;;  %v57_v46 = vld [vmem:[#allocation2 + $0x50] sm:$0xff] }
  0x54   :  { %550 = vmatprep.subr.bf16.mxu1 %v376_v47  ;;  %580 = vmatprep.mubr.bf16.mxu1 %v1411_v57  ;;  %v339_v47 = vunpack.c.h.s8.bf16 %v135_v45  ;;  %v181_v48 = vunpack.c.h.s8.bf16 %v57_v46  ;;  %v177_v55 = vunpack.c.l.s8.bf16 %v57_v46 }
  0x55   :  { %537 = vmatprep.mubr.bf16.mxu0 %v1477_v50 }
  0x56   :  { %508 = vmatpush1.bf16.msra.mxu0 %v311_v51  ;;  %v178_v51 = vunpack.c.l.s8.bf16 %v58_v38 }
  0x57   :  { %551 = vmatpush1.bf16.msra.mxu1 %v375_v52  ;;  %509 = vmatprep.subr.bf16.mxu0 %v308_v53  ;;  %v132_v52 = vld [vmem:[#allocation2 + $0x2a8] sm:$0xff]  ;;  %v54_v53 = vld [vmem:[#allocation2 + $0x38] sm:$0xff] }
  0x58   :  { %552 = vmatprep.subr.bf16.mxu1 %v372_v54  ;;  %v335_v54 = vunpack.c.l.s8.bf16 %v135_v45  ;;  %v332_v56 = vunpack.c.h.s8.bf16 %v132_v52  ;;  %v328_v62 = vunpack.c.l.s8.bf16 %v132_v52  ;;  %v170_v63 = vunpack.c.l.s8.bf16 %v54_v53 }
  0x5a   :  { %510 = vmatpush1.bf16.msra.mxu0 %v307_v58  ;;  %v174_v58 = vunpack.c.h.s8.bf16 %v54_v53 }
  0x5b   :  { %553 = vmatpush1.bf16.msra.mxu1 %v371_v59  ;;  %511 = vmatprep.subr.bf16.mxu0 %v304_v60  ;;  %v131_v59 = vld [vmem:[#allocation2 + $0x2a0] sm:$0xff] }
  0x5c   :  { %554 = vmatprep.subr.bf16.mxu1 %v368_v61  ;;  %v331_v60 = vunpack.c.h.s8.bf16 %v131_v59 }
  0x5e   :  { %512 = vmatpush1.bf16.msra.mxu0 %v303_v0  ;;  %v128_v0 = vld [vmem:[#allocation2 + $0x288] sm:$0xff] }
  0x5f   :  { %555 = vmatpush1.bf16.msra.mxu1 %v367_v1  ;;  %513 = vmatprep.subr.bf16.mxu0 %v300_v2  ;;  %v50_v1 = vld [vmem:[#allocation2 + $0x18] sm:$0xff]  ;;  %v327_v2 = vunpack.c.l.s8.bf16 %v131_v59  ;;  %v324_v4 = vunpack.c.h.s8.bf16 %v128_v0  ;;  %v320_v10 = vunpack.c.l.s8.bf16 %v128_v0 }
  0x60   :  { %556 = vmatprep.subr.bf16.mxu1 %v364_v3  ;;  %v166_v5 = vunpack.c.h.s8.bf16 %v50_v1  ;;  %v162_v11 = vunpack.c.l.s8.bf16 %v50_v1 }
  0x62   :  { %514 = vmatpush1.bf16.msra.mxu0 %v299_v6  ;;  %v127_v6 = vld [vmem:[#allocation2 + $0x280] sm:$0xff] }
  0x63   :  { %557 = vmatpush1.bf16.msra.mxu1 %v363_v7  ;;  %515 = vmatprep.subr.bf16.mxu0 %v296_v8  ;;  %v49_v7 = vld [vmem:[#allocation2 + $0x10] sm:$0xff]  ;;  %v323_v8 = vunpack.c.h.s8.bf16 %v127_v6 }
  0x64   :  { %558 = vmatprep.subr.bf16.mxu1 %v360_v9  ;;  %v165_v9 = vunpack.c.h.s8.bf16 %v49_v7 }
  0x66   :  { %516 = vmatpush1.bf16.msra.mxu0 %v295_v12  ;;  %v78_v12 = vld [vmem:[#allocation2 + $0xf8] sm:$0xff] }
  0x67   :  { %559 = vmatpush1.bf16.msra.mxu1 %v359_v13  ;;  %517 = vmatprep.subr.bf16.mxu0 %v292_v14  ;;  %v94_v13 = vld [vmem:[#allocation2 + $0x178] sm:$0xff]  ;;  %v319_v14 = vunpack.c.l.s8.bf16 %v127_v6  ;;  %v222_v16 = vunpack.c.h.s8.bf16 %v78_v12  ;;  %v218_v23 = vunpack.c.l.s8.bf16 %v78_v12 }
  0x68   :  { %560 = vmatprep.subr.bf16.mxu1 %v356_v15  ;;  %v161_v15 = vunpack.c.l.s8.bf16 %v49_v7  ;;  %v254_v17 = vunpack.c.h.s8.bf16 %v94_v13 }
  0x6a   :  { %518 = vmatpush1.bf16.msra.mxu0 %v291_v18  ;;  %v77_v18 = vld [vmem:[#allocation2 + $0xf0] sm:$0xff] }
  0x6b   :  { %561 = vmatpush1.bf16.msra.mxu1 %v355_v19  ;;  %519 = vmatprep.subr.bf16.mxu0 %v288_v20  ;;  %v93_v19 = vld [vmem:[#allocation2 + $0x170] sm:$0xff] }
  0x6c   :  { %562 = vmatprep.subr.bf16.mxu1 %v352_v21  ;;  %v1493_v20 = vld [vmem:[%s1615_s0 + $0x10] ss:$28 sps:$4 sm:$0xff]   ;;  %v221_v21 = vunpack.c.h.s8.bf16 %v77_v18  ;;  %v253_v22 = vunpack.c.h.s8.bf16 %v93_v19  ;;  %v249_v29 = vunpack.c.l.s8.bf16 %v93_v19 }
  0x6e   :  { %520 = vmatpush1.bf16.msra.mxu0 %v287_v25  ;;  %v250_v25 = vunpack.c.l.s8.bf16 %v94_v13 }
  0x6f   :  { %563 = vmatpush1.bf16.msra.mxu1 %v351_v26  ;;  %521 = vmatprep.subr.bf16.mxu0 %v348_v27  ;;  %v74_v26 = vld [vmem:[#allocation2 + $0xd8] sm:$0xff] }
  0x70   :  { %591 = vmatprep.subr.bf16.mxu1 %v190_v28  ;;  %v90_v27 = vld [vmem:[#allocation2 + $0x158] sm:$0xff]  ;;  %v217_v28 = vunpack.c.l.s8.bf16 %v77_v18  ;;  %v214_v30 = vunpack.c.h.s8.bf16 %v74_v26  ;;  %v210_v38 = vunpack.c.l.s8.bf16 %v74_v26 }
  0x72   :  { %581 = vmatmul.mubr.bf16.vlgmr.msra.gmra.mxu1 %v1486_v32  ;;  %522 = vmatpush2.bf16.msra.mxu0 %v347_v33  ;;  %v246_v33 = vunpack.c.h.s8.bf16 %v90_v27 }
  0x73   :  { %592 = vmatpush1.bf16.msra.mxu1 %v189_v34  ;;  %523 = vmatprep.subr.bf16.mxu0 %v344_v35  ;;  %v73_v34 = vld [vmem:[#allocation2 + $0xd0] sm:$0xff] }
  0x74   :  { %593 = vmatprep.subr.bf16.mxu1 %v186_v36  ;;  %623 = vmatprep.mubr.bf16.mxu1 %v1455_v24  ;;  %v53_v24 = vld [vmem:[#allocation2 + $0x30] sm:$0xff]  ;;  %v213_v36 = vunpack.c.h.s8.bf16 %v73_v34 }
  0x75   :  { %v173_v61 = vunpack.c.h.s8.bf16 %v53_v24  ;;  %v169_v3 = vunpack.c.l.s8.bf16 %v53_v24  ;;  %v89_v35 = vld [vmem:[#allocation2 + $0x150] sm:$0xff] }
  0x76   :  { %524 = vmatpush2.bf16.msra.mxu0 %v343_v39  ;;  %v245_v37 = vunpack.c.h.s8.bf16 %v89_v35  ;;  %v242_v39 = vunpack.c.l.s8.bf16 %v90_v27  ;;  %v241_v45 = vunpack.c.l.s8.bf16 %v89_v35  ;;  %v102_v27 = vld [vmem:[#allocation2 + $0x1b8] sm:$0xff]  ;;  %v101_v35 = vld [vmem:[#allocation2 + $0x1b0] sm:$0xff] }
  0x77   :  { %594 = vmatpush1.bf16.msra.mxu1 %v185_v40  ;;  %525 = vmatprep.subr.bf16.mxu0 %v340_v41  ;;  %v70_v40 = vld [vmem:[#allocation2 + $0xb8] sm:$0xff] }
  0x78   :  { %595 = vmatprep.subr.bf16.mxu1 %v182_v44  ;;  %v86_v41 = vld [vmem:[#allocation2 + $0x138] sm:$0xff]  ;;  %v209_v44 = vunpack.c.l.s8.bf16 %v73_v34  ;;  %v206_v46 = vunpack.c.h.s8.bf16 %v70_v40  ;;  %v202_v52 = vunpack.c.l.s8.bf16 %v70_v40 }
  0x79   :  { %v234_v53 = vunpack.c.l.s8.bf16 %v86_v41  ;;  %v98_v40 = vld [vmem:[#allocation2 + $0x198] sm:$0xff] }
  0x7a   :  { %526 = vmatpush2.bf16.msra.mxu0 %v339_v47  ;;  %v238_v47 = vunpack.c.h.s8.bf16 %v86_v41  ;;  %v114_v41 = vld [vmem:[#allocation2 + $0x218] sm:$0xff] }
  0x7b   :  { %596 = vmatpush1.bf16.msra.mxu1 %v181_v48  ;;  %527 = vmatprep.subr.bf16.mxu0 %v336_v49  ;;  %v69_v48 = vld [vmem:[#allocation2 + $0xb0] sm:$0xff] }
  0x7c   :  { %597 = vmatprep.subr.bf16.mxu1 %v178_v51  ;;  %v205_v49 = vunpack.c.h.s8.bf16 %v69_v48 }
  0x7e   :  { %528 = vmatpush2.bf16.msra.mxu0 %v335_v54  ;;  %v66_v54 = vld [vmem:[#allocation2 + $0x98] sm:$0xff] }
  0x7f   :  { %598 = vmatpush1.bf16.msra.mxu1 %v177_v55  ;;  %529 = vmatprep.subr.bf16.mxu0 %v332_v56  ;;  %v82_v55 = vld [vmem:[#allocation2 + $0x118] sm:$0xff]  ;;  %v201_v56 = vunpack.c.l.s8.bf16 %v69_v48  ;;  %v198_v59 = vunpack.c.h.s8.bf16 %v66_v54  ;;  %v194_v0 = vunpack.c.l.s8.bf16 %v66_v54  ;;  %v97_v48 = vld [vmem:[#allocation2 + $0x190] sm:$0xff] }
  0x80   :  { %599 = vmatprep.subr.bf16.mxu1 %v174_v58  ;;  %v230_v24 = vunpack.c.h.s8.bf16 %v82_v55  ;;  %v226_v1 = vunpack.c.l.s8.bf16 %v82_v55  ;;  %v142_v54 = vld [vmem:[#allocation2 + $0x2f8] sm:$0xff] }
  0x81   :  { %v158_v55 = vld [vmem:[#allocation2 + $0x378] sm:$0xff] }
  0x82   :  { %530 = vmatpush2.bf16.msra.mxu0 %v331_v60  ;;  %v65_v60 = vld [vmem:[#allocation2 + $0x90] sm:$0xff] }
  0x83   :  { %600 = vmatpush1.bf16.msra.mxu1 %v173_v61  ;;  %531 = vmatprep.subr.bf16.mxu0 %v328_v62  ;;  %v81_v61 = vld [vmem:[#allocation2 + $0x110] sm:$0xff]  ;;  %v197_v62 = vunpack.c.h.s8.bf16 %v65_v60 }
  0x84   :  { %601 = vmatprep.subr.bf16.mxu1 %v170_v63  ;;  %v229_v63 = vunpack.c.h.s8.bf16 %v81_v61 }
  0x86   :  { %532 = vmatpush2.bf16.msra.mxu0 %v327_v2  ;;  %v110_v2 = vld [vmem:[#allocation2 + $0x1f8] sm:$0xff] }
  0x87   :  { %602 = vmatpush1.bf16.msra.mxu1 %v169_v3  ;;  %533 = vmatprep.subr.bf16.mxu0 %v324_v4  ;;  %v126_v3 = vld [vmem:[#allocation2 + $0x278] sm:$0xff]  ;;  %v193_v4 = vunpack.c.l.s8.bf16 %v65_v60  ;;  %v286_v6 = vunpack.c.h.s8.bf16 %v110_v2  ;;  %v282_v12 = vunpack.c.l.s8.bf16 %v110_v2  ;;  %v141_v60 = vld [vmem:[#allocation2 + $0x2f0] sm:$0xff] }
  0x88   :  { %603 = vmatprep.subr.bf16.mxu1 %v166_v5  ;;  %v225_v5 = vunpack.c.l.s8.bf16 %v81_v61  ;;  %v318_v7 = vunpack.c.h.s8.bf16 %v126_v3  ;;  %v314_v13 = vunpack.c.l.s8.bf16 %v126_v3  ;;  %v157_v61 = vld [vmem:[#allocation2 + $0x370] sm:$0xff]  ;;  %v138_v2 = vld [vmem:[#allocation2 + $0x2d8] sm:$0xff] }
  0x89   :  { %v154_v3 = vld [vmem:[#allocation2 + $0x358] sm:$0xff] }
  0x8a   :  { %534 = vmatpush2.bf16.msra.mxu0 %v323_v8  ;;  %v109_v8 = vld [vmem:[#allocation2 + $0x1f0] sm:$0xff] }
  0x8b   :  { %604 = vmatpush1.bf16.msra.mxu1 %v165_v9  ;;  %535 = vmatprep.subr.bf16.mxu0 %v320_v10  ;;  %v125_v9 = vld [vmem:[#allocation2 + $0x270] sm:$0xff]  ;;  %v285_v10 = vunpack.c.h.s8.bf16 %v109_v8 }
  0x8c   :  { %605 = vmatprep.subr.bf16.mxu1 %v162_v11  ;;  %v317_v11 = vunpack.c.h.s8.bf16 %v125_v9 }
  0x8e   :  { %536 = vmatpush2.bf16.msra.mxu0 %v319_v14  ;;  %v106_v14 = vld [vmem:[#allocation2 + $0x1d8] sm:$0xff] }
  0x8f   :  { %606 = vmatpush1.bf16.msra.mxu1 %v161_v15  ;;  %634 = vmatprep.subr.bf16.mxu0 %v254_v17  ;;  %v122_v15 = vld [vmem:[#allocation2 + $0x258] sm:$0xff]  ;;  %v313_v17 = vunpack.c.l.s8.bf16 %v125_v9  ;;  %v278_v18 = vunpack.c.h.s8.bf16 %v106_v14  ;;  %v274_v26 = vunpack.c.l.s8.bf16 %v106_v14  ;;  %v153_v9 = vld [vmem:[#allocation2 + $0x350] sm:$0xff] }
  0x90   :  { %607 = vmatprep.subr.bf16.mxu1 %v222_v16  ;;  %v281_v16 = vunpack.c.l.s8.bf16 %v109_v8  ;;  %v310_v19 = vunpack.c.h.s8.bf16 %v122_v15  ;;  %v137_v8 = vld [vmem:[#allocation2 + $0x2d0] sm:$0xff]  ;;  %v150_v14 = vld [vmem:[#allocation2 + $0x338] sm:$0xff] }
  0x91   :  { %538 = vmatmul.mubr.bf16.vlgmr.msra.gmra.mxu0 %v1493_v20 }
  0x92   :  { %635 = vmatpush1.bf16.msra.mxu0 %v253_v22  ;;  %666 = vmatprep.mubr.bf16.mxu0 %v1460_v31  ;;  %v85_v31 = vld [vmem:[#allocation2 + $0x130] sm:$0xff] }
  0x93   :  { %608 = vmatpush2.bf16.msra.mxu1 %v221_v21  ;;  %636 = vmatprep.subr.bf16.mxu0 %v250_v25  ;;  %v237_v51 = vunpack.c.h.s8.bf16 %v85_v31  ;;  %v233_v58 = vunpack.c.l.s8.bf16 %v85_v31  ;;  %v105_v21 = vld [vmem:[#allocation2 + $0x1d0] sm:$0xff] }
  0x94   :  { %609 = vmatprep.subr.bf16.mxu1 %v218_v23  ;;  %v121_v22 = vld [vmem:[#allocation2 + $0x250] sm:$0xff]  ;;  %v277_v23 = vunpack.c.h.s8.bf16 %v105_v21 }
  0x95   :  { %v309_v25 = vunpack.c.h.s8.bf16 %v121_v22  ;;  %v113_v31 = vld [vmem:[#allocation2 + $0x210] sm:$0xff] }
  0x96   :  { %637 = vmatpush1.bf16.msra.mxu0 %v249_v29  ;;  %v273_v29 = vunpack.c.l.s8.bf16 %v105_v21 }
  0x97   :  { %610 = vmatpush2.bf16.msra.mxu1 %v217_v28  ;;  %638 = vmatprep.subr.bf16.mxu0 %v246_v33  ;;  %v118_v28 = vld [vmem:[#allocation2 + $0x238] sm:$0xff]  ;;  %v270_v33 = vunpack.c.h.s8.bf16 %v102_v27 }
  0x98   :  { %611 = vmatprep.subr.bf16.mxu1 %v214_v30  ;;  %v305_v30 = vunpack.c.l.s8.bf16 %v121_v22  ;;  %v302_v34 = vunpack.c.h.s8.bf16 %v118_v28 }
  0x9a   :  { %639 = vmatpush1.bf16.msra.mxu0 %v245_v37 }
  0x9b   :  { %612 = vmatpush2.bf16.msra.mxu1 %v213_v36  ;;  %640 = vmatprep.subr.bf16.mxu0 %v242_v39  ;;  %v269_v36 = vunpack.c.h.s8.bf16 %v101_v35  ;;  %v298_v39 = vunpack.c.l.s8.bf16 %v118_v28 }
  0x9c   :  { %613 = vmatprep.subr.bf16.mxu1 %v210_v38  ;;  %v266_v38 = vunpack.c.l.s8.bf16 %v102_v27 }
  0x9e   :  { %641 = vmatpush1.bf16.msra.mxu0 %v241_v45 }
  0x9f   :  { %614 = vmatpush2.bf16.msra.mxu1 %v209_v44  ;;  %642 = vmatprep.subr.bf16.mxu0 %v238_v47  ;;  %v265_v44 = vunpack.c.l.s8.bf16 %v101_v35  ;;  %v294_v47 = vunpack.c.h.s8.bf16 %v114_v41 }
  0xa0   :  { %615 = vmatprep.subr.bf16.mxu1 %v206_v46  ;;  %v262_v46 = vunpack.c.h.s8.bf16 %v98_v40 }
  0xa2   :  { %643 = vmatpush1.bf16.msra.mxu0 %v237_v51  ;;  %v293_v51 = vunpack.c.h.s8.bf16 %v113_v31 }
  0xa3   :  { %616 = vmatpush2.bf16.msra.mxu1 %v205_v49  ;;  %644 = vmatprep.subr.bf16.mxu0 %v234_v53  ;;  %v261_v49 = vunpack.c.h.s8.bf16 %v97_v48  ;;  %v290_v53 = vunpack.c.l.s8.bf16 %v114_v41  ;;  %v1325_v41 = vld [vmem:[%s1619_s4 + $0xb8] sm:$0xff]  }
  0xa4   :  { %617 = vmatprep.subr.bf16.mxu1 %v202_v52  ;;  %v258_v52 = vunpack.c.l.s8.bf16 %v98_v40  ;;  %v1324_v40 = vld [vmem:[%s1619_s4 + $0xf8] sm:$0xff]  }
  0xa6   :  { %645 = vmatpush1.bf16.msra.mxu0 %v233_v58  ;;  %v289_v58 = vunpack.c.l.s8.bf16 %v113_v31  ;;  %v1334_v31 = vld [vmem:[%s1619_s4 + $0x68] sm:$0xff]  }
  0xa7   :  { %618 = vmatpush2.bf16.msra.mxu1 %v201_v56  ;;  %646 = vmatprep.subr.bf16.mxu0 %v230_v24  ;;  %v257_v56 = vunpack.c.l.s8.bf16 %v97_v48  ;;  %v382_v24 = vunpack.c.h.s8.bf16 %v158_v55  ;;  %v1331_v48 = vld [vmem:[%s1619_s4 + $0xe8] sm:$0xff]  }
  0xa8   :  { %619 = vmatprep.subr.bf16.mxu1 %v198_v59  ;;  %v350_v59 = vunpack.c.h.s8.bf16 %v142_v54 }
  0xaa   :  { %647 = vmatpush1.bf16.msra.mxu0 %v229_v63  ;;  %v381_v63 = vunpack.c.h.s8.bf16 %v157_v61 }
  0xab   :  { %620 = vmatpush2.bf16.msra.mxu1 %v197_v62  ;;  %648 = vmatprep.subr.bf16.mxu0 %v226_v1  ;;  %v349_v62 = vunpack.c.h.s8.bf16 %v141_v60  ;;  %v378_v1 = vunpack.c.l.s8.bf16 %v158_v55  ;;  %v1339_v55 = vld [vmem:[%s1619_s4 + $0xd8] sm:$0xff]  }
  0xac   :  { %621 = vmatprep.subr.bf16.mxu1 %v194_v0  ;;  %v346_v0 = vunpack.c.l.s8.bf16 %v142_v54  ;;  %v1338_v54 = vld [vmem:[%s1619_s4 + $0x60] sm:$0xff]  }
  0xae   :  { %649 = vmatpush1.bf16.msra.mxu0 %v225_v5  ;;  %v377_v5 = vunpack.c.l.s8.bf16 %v157_v61  ;;  %v1345_v61 = vld [vmem:[%s1619_s4 + $0x90] sm:$0xff]  }
  0xaf   :  { %622 = vmatpush2.bf16.msra.mxu1 %v193_v4  ;;  %650 = vmatprep.subr.bf16.mxu0 %v286_v6  ;;  %v345_v4 = vunpack.c.l.s8.bf16 %v141_v60  ;;  %v342_v6 = vunpack.c.h.s8.bf16 %v138_v2  ;;  %v1344_v60 = vld [vmem:[%s1619_s4 + $0x18] sm:$0xff]  }
  0xb0   :  { %677 = vmatprep.subr.bf16.mxu1 %v318_v7  ;;  %v374_v7 = vunpack.c.h.s8.bf16 %v154_v3 }
  0xb2   :  { %624 = vmatmul.mubr.bf16.vlgmr.msra.gmra.mxu1 %v1467_v42  ;;  %651 = vmatpush2.bf16.msra.mxu0 %v285_v10  ;;  %v306_v42 = vunpack.c.l.s8.bf16 %v122_v15  ;;  %v341_v10 = vunpack.c.h.s8.bf16 %v137_v8  ;;  %v337_v15 = vunpack.c.l.s8.bf16 %v137_v8 }
  0xb3   :  { %678 = vmatpush1.bf16.msra.mxu1 %v317_v11  ;;  %652 = vmatprep.subr.bf16.mxu0 %v282_v12  ;;  %v373_v11 = vunpack.c.h.s8.bf16 %v153_v9  ;;  %v338_v12 = vunpack.c.l.s8.bf16 %v138_v2  ;;  %v1350_v2 = vld [vmem:[%s1619_s4 + $0x48] sm:$0xff]  }
  0xb4   :  { %679 = vmatprep.subr.bf16.mxu1 %v314_v13  ;;  %709 = vmatprep.mubr.bf16.mxu1 %v1477_v50  ;;  %v117_v50 = vld [vmem:[#allocation2 + $0x230] sm:$0xff]  ;;  %v134_v13 = vld [vmem:[#allocation2 + $0x2b8] sm:$0xff] }
  0xb5   :  { %v301_v37 = vunpack.c.h.s8.bf16 %v117_v50  ;;  %v297_v45 = vunpack.c.l.s8.bf16 %v117_v50 }
  0xb6   :  { %653 = vmatpush2.bf16.msra.mxu0 %v281_v16  ;;  %v369_v16 = vunpack.c.l.s8.bf16 %v153_v9 }
  0xb7   :  { %680 = vmatpush1.bf16.msra.mxu1 %v313_v17  ;;  %654 = vmatprep.subr.bf16.mxu0 %v278_v18  ;;  %v334_v17 = vunpack.c.h.s8.bf16 %v134_v13  ;;  %v366_v18 = vunpack.c.h.s8.bf16 %v150_v14 }
  0xb8   :  { %681 = vmatprep.subr.bf16.mxu1 %v310_v19  ;;  %v133_v19 = vld [vmem:[#allocation2 + $0x2b0] sm:$0xff] }
  0xb9   :  { %v333_v21 = vunpack.c.h.s8.bf16 %v133_v19  ;;  %v329_v27 = vunpack.c.l.s8.bf16 %v133_v19 }
  0xba   :  { %655 = vmatpush2.bf16.msra.mxu0 %v277_v23  ;;  %v330_v23 = vunpack.c.l.s8.bf16 %v134_v13 }
  0xbb   :  { %682 = vmatpush1.bf16.msra.mxu1 %v309_v25  ;;  %656 = vmatprep.subr.bf16.mxu0 %v274_v26  ;;  %v362_v25 = vunpack.c.l.s8.bf16 %v150_v14  ;;  %v130_v26 = vld [vmem:[#allocation2 + $0x298] sm:$0xff] }
  0xbc   :  { %683 = vmatprep.subr.bf16.mxu1 %v306_v42  ;;  %v146_v42 = vld [vmem:[#allocation2 + $0x318] sm:$0xff] }
  0xbe   :  { %657 = vmatpush2.bf16.msra.mxu0 %v273_v29  ;;  %v326_v29 = vunpack.c.h.s8.bf16 %v130_v26 }
  0xbf   :  { %684 = vmatpush1.bf16.msra.mxu1 %v305_v30  ;;  %658 = vmatprep.subr.bf16.mxu0 %v270_v33  ;;  %v358_v30 = vunpack.c.h.s8.bf16 %v146_v42  ;;  %v129_v33 = vld [vmem:[#allocation2 + $0x290] sm:$0xff] }
  0xc0   :  { %685 = vmatprep.subr.bf16.mxu1 %v302_v34  ;;  %v145_v34 = vld [vmem:[#allocation2 + $0x310] sm:$0xff]  ;;  %v325_v35 = vunpack.c.h.s8.bf16 %v129_v33 }
  0xc1   :  { %v357_v50 = vunpack.c.h.s8.bf16 %v145_v34 }
  0xc2   :  { %659 = vmatpush2.bf16.msra.mxu0 %v269_v36  ;;  %v322_v36 = vunpack.c.l.s8.bf16 %v130_v26  ;;  %v765_v26 = vlaneseq }
  0xc3   :  { %686 = vmatpush1.bf16.msra.mxu1 %v301_v37  ;;  %660 = vmatprep.subr.bf16.mxu0 %v266_v38  ;;  %v354_v37 = vunpack.c.l.s8.bf16 %v146_v42  ;;  %v321_v38 = vunpack.c.l.s8.bf16 %v129_v33 }
  0xc4   :  { %687 = vmatprep.subr.bf16.mxu1 %v298_v39  ;;  %v353_v39 = vunpack.c.l.s8.bf16 %v145_v34 }
  0xc6   :  { %661 = vmatpush2.bf16.msra.mxu0 %v265_v44  ;;  %v1326_v44 = vld [vmem:[%s1619_s4 + $0x78] sm:$0xff]  }
  0xc7   :  { %688 = vmatpush1.bf16.msra.mxu1 %v297_v45  ;;  %662 = vmatprep.subr.bf16.mxu0 %v262_v46  ;;  %v1327_v45 = vld [vmem:[%s1619_s4 + $0xf0] sm:$0xff]  }
  0xc8   :  { %689 = vmatprep.subr.bf16.mxu1 %v294_v47  ;;  %v1329_v46 = vld [vmem:[%s1619_s4 + $0xb0] sm:$0xff]  }
  0xc9   :  { %v1332_v47 = vld [vmem:[%s1619_s4 + $0x30] sm:$0xff]  }
  0xca   :  { %663 = vmatpush2.bf16.msra.mxu0 %v261_v49  ;;  %v1333_v49 = vld [vmem:[%s1619_s4 + $0xa8] sm:$0xff]  }
  0xcb   :  { %690 = vmatpush1.bf16.msra.mxu1 %v293_v51  ;;  %664 = vmatprep.subr.bf16.mxu0 %v258_v52  ;;  %v1336_v51 = vld [vmem:[%s1619_s4 + $0x28] sm:$0xff]   ;;  %v1335_v52 = vld [vmem:[%s1619_s4 + $0xe0] sm:$0xff]  }
  0xcc   :  { %691 = vmatprep.subr.bf16.mxu1 %v290_v53  ;;  %v1337_v53 = vld [vmem:[%s1619_s4 + $0xa0] sm:$0xff]  }
  0xce   :  { %665 = vmatpush2.bf16.msra.mxu0 %v257_v56  ;;  %v1340_v56 = vld [vmem:[%s1619_s4 + $0x20] sm:$0xff]  }
  0xcf   :  { %692 = vmatpush1.bf16.msra.mxu1 %v289_v58  ;;  %720 = vmatprep.subr.bf16.mxu0 %v382_v24  ;;  %v1341_v58 = vld [vmem:[%s1619_s4 + $0x98] sm:$0xff]   ;;  %v1343_v24 = vld [vmem:[%s1619_s4 + $0xd0] sm:$0xff]  }
  0xd0   :  { %693 = vmatprep.subr.bf16.mxu1 %v350_v59  ;;  %v1342_v59 = vld [vmem:[%s1619_s4 + $0x58] sm:$0xff]  }
  0xd1   :  { %667 = vmatmul.mubr.bf16.vlgmr.msra.gmra.mxu0 %v1472_v43  ;;  %v370_v43 = vunpack.c.l.s8.bf16 %v154_v3  ;;  %v1351_v3 = vld [vmem:[%s1619_s4 + $0xc0] sm:$0xff]  }
  0xd2   :  { %721 = vmatpush1.bf16.msra.mxu0 %v381_v63  ;;  %752 = vmatprep.mubr.bf16.mxu0 %v1411_v57  ;;  %v149_v57 = vld [vmem:[#allocation2 + $0x330] sm:$0xff]  ;;  %v1347_v63 = vld [vmem:[%s1619_s4 + $0xc8] sm:$0xff]  }
  0xd3   :  { %694 = vmatpush2.bf16.msra.mxu1 %v349_v62  ;;  %722 = vmatprep.subr.bf16.mxu0 %v378_v1  ;;  %v365_v22 = vunpack.c.h.s8.bf16 %v149_v57  ;;  %v361_v28 = vunpack.c.l.s8.bf16 %v149_v57  ;;  %v1346_v62 = vld [vmem:[%s1619_s4 + $0x50] sm:$0xff]   ;;  %v1349_v1 = vld [vmem:[%s1619_s4 + $0x88] sm:$0xff]  }
  0xd4   :  { %695 = vmatprep.subr.bf16.mxu1 %v346_v0  ;;  %v1348_v0 = vld [vmem:[%s1619_s4 + $0x10] sm:$0xff]  }
  0xd6   :  { %723 = vmatpush1.bf16.msra.mxu0 %v377_v5  ;;  %v1353_v5 = vld [vmem:[%s1619_s4 + $0x80] sm:$0xff]  }
  0xd7   :  { %696 = vmatpush2.bf16.msra.mxu1 %v345_v4  ;;  %724 = vmatprep.subr.bf16.mxu0 %v374_v7  ;;  %v1352_v4 = vld [vmem:[%s1619_s4 + $0x8] sm:$0xff]   ;;  %v1355_v7 = vld [vmem:[%s1619_s4] sm:$0xff]  }
  0xd8   :  { %697 = vmatprep.subr.bf16.mxu1 %v342_v6  ;;  %v1354_v6 = vld [vmem:[%s1619_s4 + $0x40] sm:$0xff]  }
  0xda   :  { %725 = vmatpush1.bf16.msra.mxu0 %v373_v11 }
  0xdb   :  { %698 = vmatpush2.bf16.msra.mxu1 %v341_v10  ;;  %726 = vmatprep.subr.bf16.mxu0 %v370_v43 }
  0xdc   :  { %699 = vmatprep.subr.bf16.mxu1 %v338_v12 }
  0xde   :  { %727 = vmatpush1.bf16.msra.mxu0 %v369_v16 }
  0xdf   :  { %700 = vmatpush2.bf16.msra.mxu1 %v337_v15  ;;  %728 = vmatprep.subr.bf16.mxu0 %v366_v18 }
  0xe0   :  { %701 = vmatprep.subr.bf16.mxu1 %v334_v17 }
  0xe2   :  { %729 = vmatpush1.bf16.msra.mxu0 %v365_v22 }
  0xe3   :  { %702 = vmatpush2.bf16.msra.mxu1 %v333_v21  ;;  %730 = vmatprep.subr.bf16.mxu0 %v362_v25 }
  0xe4   :  { %703 = vmatprep.subr.bf16.mxu1 %v330_v23 }
  0xe6   :  { %731 = vmatpush1.bf16.msra.mxu0 %v361_v28 }
  0xe7   :  { %704 = vmatpush2.bf16.msra.mxu1 %v329_v27  ;;  %732 = vmatprep.subr.bf16.mxu0 %v358_v30 }
  0xe8   :  { %705 = vmatprep.subr.bf16.mxu1 %v326_v29  ;;  %v766_v29 = vshrl.u32 %v765_v26, 7 }
  0xea   :  { %733 = vmatpush1.bf16.msra.mxu0 %v357_v50 }
  0xeb   :  { %706 = vmatpush2.bf16.msra.mxu1 %v325_v35  ;;  %734 = vmatprep.subr.bf16.mxu0 %v354_v37 }
  0xec   :  { %707 = vmatprep.subr.bf16.mxu1 %v322_v36  ;;  %v767_v36 = vsub.s32 0, %v766_v29 }
  0xee   :  { %735 = vmatpush1.bf16.msra.mxu0 %v353_v39  ;;  %v775_v39 = vsub.s32 2, %v766_v29 }
  0xef   :  { %708 = vmatpush2.bf16.msra.mxu1 %v321_v38  ;;  %1264 = vmatprep.subr.bf16.mxu0 %v1326_v44  ;;  %v763_v38 = vld [vmem:[%s1617_s2] sm:$0xf]  ;;  %v771_v44 = vsub.s32 1, %v766_v29 }
  0xf0   :  { %1286 = vmatprep.subr.bf16.mxu1 %v1324_v40 }
  0xf1   :  { %753 = vmatmul.mubr.bf16.vlgmr.msra.gmra.mxu0 %v1486_v32  ;;  %v1328_v32 = vld [vmem:[%s1619_s4 + $0x38] sm:$0xff]  }
  0xf2   :  { %710 = vmatmul.mubr.bf16.vlgmr.msra.gmra.mxu1 %v1493_v20  ;;  %v1330_v20 = vld [vmem:[%s1619_s4 + $0x70] sm:$0xff]   ;;  %1265 = vmatpush3.bf16.msra.mxu0 %v1328_v32 }
  0xf3   :  { %1287 = vmatpush3.bf16.msra.mxu1 %v1325_v41  ;;  %1266 = vmatprep.subr.bf16.mxu0 %v1330_v20 }
  0xf4   :  { %1288 = vmatprep.subr.bf16.mxu1 %v1327_v45 }
  0xf6   :  { %1267 = vmatpush3.bf16.msra.mxu0 %v1332_v47  ;;  %v779_v47 = vsub.s32 3, %v766_v29 }
  0xf7   :  { %1289 = vmatpush3.bf16.msra.mxu1 %v1329_v46  ;;  %1268 = vmatprep.subr.bf16.mxu0 %v1334_v31 }
  0xf8   :  { %1290 = vmatprep.subr.bf16.mxu1 %v1331_v48  ;;  %v768_v48 = vrot.slane %v763_v38, %v767_v36 }
  0xfa   :  { %1269 = vmatpush3.bf16.msra.mxu0 %v1336_v51 }
  0xfb   :  { %1291 = vmatpush3.bf16.msra.mxu1 %v1333_v49  ;;  %1270 = vmatprep.subr.bf16.mxu0 %v1338_v54 }
  0xfc   :  { %1292 = vmatprep.subr.bf16.mxu1 %v1335_v52 }
  0xfe   :  { %1271 = vmatpush3.bf16.msra.mxu0 %v1340_v56  ;;  %v776_v56 = vrot.slane %v763_v38, %v775_v39 }
  0xff   :  { %1293 = vmatpush3.bf16.msra.mxu1 %v1337_v53  ;;  %1272 = vmatprep.subr.bf16.mxu0 %v1342_v59  ;;  %v793_v53 = vld [vmem:[%s1618_s3] sm:$0xf]  ;;  %v772_v59 = vrot.slane %v763_v38, %v771_v44 }
 0x100   :  { %1294 = vmatprep.subr.bf16.mxu1 %v1339_v55 }
 0x102   :  { %1273 = vmatpush3.bf16.msra.mxu0 %v1344_v60  ;;  %v806_v60 = vrot.slane %v793_v53, %v775_v39 }
 0x103   :  { %1295 = vmatpush3.bf16.msra.mxu1 %v1341_v58  ;;  %1274 = vmatprep.subr.bf16.mxu0 %v1346_v62 }
 0x104   :  { %1296 = vmatprep.subr.bf16.mxu1 %v1343_v24 }
 0x106   :  { %1275 = vmatpush3.bf16.msra.mxu0 %v1348_v0 }
 0x107   :  { %1297 = vmatpush3.bf16.msra.mxu1 %v1345_v61  ;;  %1276 = vmatprep.subr.bf16.mxu0 %v1350_v2  ;;  %v780_v2 = vrot.slane %v763_v38, %v779_v47 }
 0x108   :  { %1298 = vmatprep.subr.bf16.mxu1 %v1347_v63 }
 0x10a   :  { %1277 = vmatpush3.bf16.msra.mxu0 %v1352_v4 }
 0x10b   :  { %1299 = vmatpush3.bf16.msra.mxu1 %v1349_v1  ;;  %1278 = vmatprep.subr.bf16.mxu0 %v1354_v6  ;;  %v810_v6 = vrot.slane %v793_v53, %v779_v47 }
 0x10c   :  { %1300 = vmatprep.subr.bf16.mxu1 %v1351_v3  ;;  %v798_v3 = vrot.slane %v793_v53, %v767_v36 }
 0x10e   :  { %1279 = vmatpush3.bf16.msra.mxu0 %v1355_v7 }
 0x10f   :  { %1301 = vmatpush3.bf16.msra.mxu1 %v1353_v5 }
 0x111   :  { %v453_v8 = vpop.f32.mrf.mxu0 }
 0x112   :  { %v496_v9 = vpop.f32.mrf.mxu1 }
 0x113   :  { %v455_v10 = vpop.f32.mrf.mxu0  ;;  %v497_v50 = vadd.f32 %v496_v9, %v453_v8 }
 0x114   :  { %v498_v11 = vpop.f32.mrf.mxu1 }
 0x115   :  { %v457_v12 = vpop.f32.mrf.mxu0  ;;  %v499_v40 = vadd.f32 %v498_v11, %v455_v10 }
 0x116   :  { %v500_v43 = vpop.f32.mrf.mxu1 }
 0x117   :  { %v459_v13 = vpop.f32.mrf.mxu0  ;;  %v501_v28 = vadd.f32 %v500_v43, %v457_v12 }
 0x118   :  { %v502_v14 = vpop.f32.mrf.mxu1 }
 0x119   :  { %v503_v30 = vadd.f32 %v502_v14, %v459_v13  ;;  %v802_v13 = vrot.slane %v793_v53, %v771_v44 }
 0x132   :  { %v582_v15 = vpop.f32.mrf.mxu1 }
 0x134   :  { %v584_v17 = vpop.f32.mrf.mxu1 }
 0x136   :  { %v586_v19 = vpop.f32.mrf.mxu1 }
 0x138   :  { %v588_v21 = vpop.f32.mrf.mxu1 }
 0x151   :  { %v539_v16 = vpop.f32.mrf.mxu0 }
 0x152   :  { %v540_v41 = vadd.f32 %v539_v16, %v497_v50 }
 0x153   :  { %v541_v18 = vpop.f32.mrf.mxu0 }
 0x154   :  { %v542_v31 = vadd.f32 %v541_v18, %v499_v40  ;;  %v583_v58 = vadd.f32 %v582_v15, %v540_v41 }
 0x155   :  { %v543_v57 = vpop.f32.mrf.mxu0 }
 0x156   :  { %v544_v33 = vadd.f32 %v543_v57, %v501_v28  ;;  %v585_v4 = vadd.f32 %v584_v17, %v542_v31  ;;  %v785_v43 = vmul.f32 %v768_v48, %v583_v58 }
 0x157   :  { %v545_v22 = vpop.f32.mrf.mxu0 }
 0x158   :  { %v546_v37 = vadd.f32 %v545_v22, %v503_v30  ;;  %v587_v45 = vadd.f32 %v586_v19, %v544_v33 }
 0x15a   :  { %v589_v49 = vadd.f32 %v588_v21, %v546_v37  ;;  %v789_v24 = vmul.f32 %v768_v48, %v587_v45  ;;  %v786_v21 = vmul.f32 %v772_v59, %v585_v4  ;;  %v1231_v48 = vld [vmem:[%s1620_s5] ss:$0 sm:$0xff]  ;;  %s1412_s5 = smov 118  }
 0x15c   :  { %v790_v5 = vmul.f32 %v772_v59, %v589_v49  ;;  %v819_v14 = vadd.f32 %v798_v3, %v789_v24 }
 0x15e   :  { %v820_v22 = vadd.f32 %v802_v13, %v790_v5 }
 0x172   :  { %v625_v23 = vpop.f32.mrf.mxu1 }
 0x174   :  { %v627_v42 = vpop.f32.mrf.mxu1 }
 0x176   :  { %v629_v34 = vpop.f32.mrf.mxu1 }
 0x178   :  { %v631_v32 = vpop.f32.mrf.mxu1 }
 0x191   :  { %v668_v25 = vpop.f32.mrf.mxu0 }
 0x192   :  { %v669_v46 = vadd.f32 %v668_v25, %v625_v23 }
 0x193   :  { %v670_v27 = vpop.f32.mrf.mxu0 }
 0x194   :  { %v671_v54 = vadd.f32 %v670_v27, %v627_v42  ;;  %v815_v27 = vadd.f32 %v798_v3, %v785_v43 }
 0x195   :  { %v672_v35 = vpop.f32.mrf.mxu0 }
 0x196   :  { %v673_v63 = vadd.f32 %v672_v35, %v629_v34  ;;  %v816_v34 = vadd.f32 %v802_v13, %v786_v21 }
 0x197   :  { %v674_v20 = vpop.f32.mrf.mxu0 }
 0x198   :  { %v675_v9 = vadd.f32 %v674_v20, %v631_v32 }
 0x1b1   :  { %v754_v52 = vpop.f32.mrf.mxu0 }
 0x1b2   :  { %v711_v51 = vpop.f32.mrf.mxu1 }
 0x1b3   :  { %v712_v55 = vadd.f32 %v711_v51, %v669_v46  ;;  %v756_v62 = vpop.f32.mrf.mxu0 }
 0x1b4   :  { %v713_v61 = vpop.f32.mrf.mxu1 }
 0x1b5   :  { %v755_v0 = vadd.f32 %v754_v52, %v712_v55  ;;  %v714_v1 = vadd.f32 %v713_v61, %v671_v54  ;;  %v758_v8 = vpop.f32.mrf.mxu0 }
 0x1b6   :  { %v715_v7 = vpop.f32.mrf.mxu1 }
 0x1b7   :  { %v787_v10 = vmul.f32 %v776_v56, %v755_v0  ;;  %v757_v11 = vadd.f32 %v756_v62, %v714_v1  ;;  %v716_v12 = vadd.f32 %v715_v7, %v673_v63  ;;  %v760_v23 = vpop.f32.mrf.mxu0 }
 0x1b8   :  { %v717_v15 = vpop.f32.mrf.mxu1 }
 0x1b9   :  { %v817_v16 = vadd.f32 %v806_v60, %v787_v10  ;;  %v788_v18 = vmul.f32 %v780_v2, %v757_v11  ;;  %v759_v19 = vadd.f32 %v758_v8, %v716_v12  ;;  %v718_v57 = vadd.f32 %v717_v15, %v675_v9 }
 0x1bb   :  { %v825_v17 = vadd.f32 %v819_v14, %v817_v16  ;;  %v818_v25 = vadd.f32 %v810_v6, %v788_v18  ;;  %v791_v26 = vmul.f32 %v776_v56, %v759_v19  ;;  %v761_v42 = vadd.f32 %v760_v23, %v718_v57 }
 0x1bd   :  { %v821_v28 = vadd.f32 %v806_v60, %v791_v26  ;;  %v792_v29 = vmul.f32 %v780_v2, %v761_v42  ;;  %v826_v30 = vadd.f32 %v820_v22, %v818_v25  ;;  %v829_v33 = vmax.f32 %v825_v17, 0.0 }
 0x1bf   :  { %v823_v35 = vsub.f32 %v815_v27, %v821_v28  ;;  %v822_v50 = vadd.f32 %v810_v6, %v792_v29  ;;  %v830_v36 = vmax.f32 %v826_v30, 0.0  ;;  %v833_v40 = vpack.c.bf16 %v829_v33, %v829_v33 }
 0x1c1   :  { %v834_v37 = vpack.c.bf16 %v830_v36, %v830_v36  ;;  %v824_v38 = vsub.f32 %v816_v34, %v822_v50  ;;  %v827_v39 = vmax.f32 %v823_v35, 0.0 }
 0x1c3   :  { %1170 = vmatprep.mubr.bf16.mxu1 %v834_v37  ;;  %v828_v41 = vmax.f32 %v824_v38, 0.0  ;;  %v831_v45 = vpack.c.bf16 %v827_v39, %v827_v39 }
 0x1c4   :  { %1171 = vmatmul.mubr.bf16.vlgmr.msra.gmra.mxu1 %v833_v40 }
 0x1c5   :  { %v832_v44 = vpack.c.bf16 %v828_v41, %v828_v41 }
 0x1c7   :  { %1130 = vmatprep.mubr.bf16.mxu0 %v832_v44 }
 0x1c8   :  { %1131 = vmatmul.mubr.bf16.vlgmr.msra.gmra.mxu0 %v831_v45 }
 0x284   :  { %v1302_v32 = vpop.f32.mrf.mxu1 }
 0x286   :  { %v1303_v20 = vpop.f32.mrf.mxu1 }
 0x287   :  { %v1304_v53 = vadd.f32 %v1303_v20, %v1302_v32 }
 0x288   :  { %v1280_v46 = vpop.f32.mrf.mxu0  ;;  %v1305_v47 = vpop.f32.mrf.mxu1 }
 0x28a   :  { %v1281_v31 = vpop.f32.mrf.mxu0  ;;  %v1306_v49 = vpop.f32.mrf.mxu1 }
 0x28b   :  { %v1282_v51 = vadd.f32 %v1281_v31, %v1280_v46 }
 0x28c   :  { %v1283_v52 = vpop.f32.mrf.mxu0 }
 0x28d   :  { %v1133_v54 = vadd.f32 %v1282_v51, %v1231_v48 }
 0x28e   :  { %v1284_v55 = vpop.f32.mrf.mxu0 }
 0x28f   :  { %v1173_v56 = vadd.f32 %v1304_v53, %v1133_v54 }
 0x291   :  { %v1191_v58 = vsel %vm1190_vm0, %v1173_v56, -inf  ;;  %v1179_v59 = vsel %vm1178_vm1, %v1173_v56, -inf }
 0x292   :  { %1192 = vmax.xlane.f32.xlu0 %v1191_v58 }
 0x296   :  { %1180 = vmax.xlane.f32.xlu0 %v1179_v59 }
 0x31b   :  { %v1193_v24 = vpop.xlane.xlu0 %1192 }
 0x31c   :  { %v1194_v60 = vsub.f32 %v1173_v56, %v1193_v24 }
 0x31e   :  { %v1195_v61 = vmul.f32 1.442695, %v1194_v60 }
 0x31f   :  { %v1181_v63 = vpop.xlane.xlu0 %1180 }
 0x320   :  { %1356 = vpow2.f32 %v1195_v61  ;;  %v1182_v0 = vsub.f32 %v1173_v56, %v1181_v63 }
 0x322   :  { %v1183_v1 = vmul.f32 1.442695, %v1182_v0 }
 0x324   :  { %1358 = vpow2.f32 %v1183_v1 }
 0x32d   :  { %v1357_v62 = vpop.eup %1356 }
 0x32e   :  { %1198 = vrot.lane.b32.xlu1 %v1357_v62, %s1412_s5 }
 0x331   :  { %v1359_v2 = vpop.eup %1358 }
 0x332   :  { %v1185_v3 = vsel %vm1178_vm1, %v1359_v2, 0.0 }
 0x352   :  { %1186 = vadd.xlane.f32.xlu1 %v1185_v3 }
 0x3a0   :  { %v1199_v4 = vpop.permute.xlu1 %1198 }
 0x3a1   :  { %v1201_v5 = vsel %vm1178_vm1, %v1199_v4, 0.0 }
 0x3a2   :  { %1202 = vadd.xlane.f32.xlu0 %v1201_v5 }
 0x3db   :  { %v1187_v6 = vpop.xlane.xlu1 %1186 }
 0x3dc   :  { %1360 = vrcp.f32 %v1187_v6 }
 0x3e9   :  { %v1361_v8 = vpop.eup %1360 }
 0x3ea   :  { %v1189_v10 = vmul.f32 %v1361_v8, %v1359_v2 }
 0x42b   :  { %v1203_v7 = vpop.xlane.xlu0 %1202 }
 0x42c   :  { %1362 = vrcp.f32 %v1203_v7 }
 0x439   :  { %v1363_v9 = vpop.eup %1362 }
 0x43a   :  { %v1205_v11 = vmul.f32 %v1363_v9, %v1357_v62 }
 0x43c   :  { %v1206_v12 = vsel %vm1178_vm1, %v1189_v10, %v1205_v11 }
 0x43d   :  { %1208 = vst.msk [vmem:[#allocation5] sm:$0xff] %vm1207_vm2, %v1206_v12 }
 0x43e   :  { %1395 = shalt.err (!%p1392_p9)
}
 0x43f   :  { %1218 = dma.vmem_to_hbm [thread:$0]  %s1216_s7, 128, %s1621_s6, [#allocation4]  }
 0x440   :  { %1406 = dma.done.wait [#allocation4], 128  }
 0x441   :  { %1407 = vsyncadd [#allocation4], 4294967168 }
 0x442   :  { %1222 = vsyncpa [#allocation3], 1 }
 0x443   :  { %1223 = vsyncpa [#allocation4], 1 }

</bundles_post_ra>
